<compile_context>
chip_gen: v5e
topology: v5e:2x2
jax: 0.10.0
libtpu: 0.0.40
codegen_flags: <defaults>
</compile_context>

<pallas_src>
import functools

import jax
import jax.numpy as jnp
from jax.experimental import pallas as pl
from jax.experimental.pallas import tpu as pltpu


def _weighted_mean_kernel(w_ref, l_ref, o_ref, *, inv_n):
    """o = sum(w * l) * inv_n.

    w_ref: [1, n] self.weight, fully resident in VMEM (any float dtype)
    l_ref: [1, n] per-scale losses, fully resident in VMEM (any float dtype)
    o_ref: [1, 1] f32
    """
    w = w_ref[...].astype(jnp.float32)          # cast at load (f32 compute)
    l = l_ref[...].astype(jnp.float32)
    total = jnp.sum(w * l)                      # one vmul + XLU cross-lane reduce
    o_ref[...] = (total * inv_n).reshape(1, 1)  # compile-time 1/n multiply


def setup_loss_mean(losses: jax.Array, weight: jax.Array) -> jax.Array:
    """Pallas equivalent of SetupLoss.mean: (weight * stack(losses)).mean().

    losses: [n_scales] per-scale loss scalars (any float dtype)
    weight: [n_scales] self.weight
    returns: scalar float32
    """
    losses = jnp.asarray(losses)
    weight = jnp.asarray(weight)
    assert losses.ndim == 1 and weight.shape == losses.shape
    n = losses.shape[0]

    # (n,) -> (1, n): zero-copy metadata reshape for a clean 2-D lane layout.
    # Full-array blocks are exempt from the (8,128) divisibility rule, so no
    # padding or masking is needed for arbitrary n.
    w2 = weight.reshape(1, n)
    l2 = losses.reshape(1, n)

    out = pl.pallas_call(
        functools.partial(_weighted_mean_kernel, inv_n=1.0 / float(n)),
        out_shape=jax.ShapeDtypeStruct((1, 1), jnp.float32),
        in_specs=[
            pl.BlockSpec(memory_space=pltpu.VMEM),   # weight
            pl.BlockSpec(memory_space=pltpu.VMEM),   # losses
        ],
        out_specs=pl.BlockSpec(memory_space=pltpu.VMEM),
        # Advisory: ~2n flops, tiny byte traffic -> let XLA schedule it freely.
        cost_estimate=pl.CostEstimate(
            flops=2 * n,
            transcendentals=0,
            bytes_accessed=weight.dtype.itemsize * n
            + losses.dtype.itemsize * n
            + 4,
        ),
    )(w2, l2)
    return out.reshape(())  # (1,1) -> scalar: layout-only reshape


def init_losses(*names):
    """Pallas-free glue mirroring SetupLoss._init_losses (zeros per name)."""
    return dict(zip(names, [jnp.zeros((), jnp.float32)] * len(names)))


if __name__ == "__main__":
    key = jax.random.PRNGKey(0)

    # SetupLoss(scales=(1, 2, 4, 8), weight=(1.0, 0.5, 0.25, 0.125))
    scales = (1, 2, 4, 8)
    weight = jnp.asarray((1.0, 0.5, 0.25, 0.125), dtype=jnp.float32)  # self.weight

    # Per-scale loss scalars as a subclass's forward would have produced them.
    losses = jax.random.uniform(key, (len(scales),), dtype=jnp.float32)

    out = jax.block_until_ready(setup_loss_mean(losses, weight))
    ref = jnp.mean(weight * losses)  # reference: (w * L).mean()
    assert jnp.allclose(out, ref, rtol=1e-6, atol=1e-6), (out, ref)

    # bf16 losses: cast happens inside the kernel (f32 compute — the portable
    # choice; v5e has no bf16 VPU path anyway).
    losses_bf16 = losses.astype(jnp.bfloat16)
    out_bf16 = jax.block_until_ready(setup_loss_mean(losses_bf16, weight))
    ref_bf16 = jnp.mean(weight * losses_bf16.astype(jnp.float32))
    assert jnp.allclose(out_bf16, ref_bf16, rtol=1e-2, atol=1e-2), (out_bf16, ref_bf16)

    print("KERNEL_OK")
</pallas_src>

<mosaic_0001>
module attributes {stable_mosaic.version = 11 : i64} {
  func.func @_weighted_mean_kernel(%arg0: memref<1x4xf32, #tpu.memory_space<vmem>>, %arg1: memref<1x4xf32, #tpu.memory_space<vmem>>, %arg2: memref<1x1xf32, #tpu.memory_space<vmem>>) attributes {dimension_semantics = [], scalar_prefetch = 0 : i64, scratch_operands = 0 : i64, tpu.core_type = #tpu.core_type<tc>} {
    %c0 = arith.constant 0 : index
    %c0_0 = arith.constant 0 : index
    %0 = vector.load %arg0[%c0, %c0_0] : memref<1x4xf32, #tpu.memory_space<vmem>>, vector<1x4xf32>
    %c0_1 = arith.constant 0 : index
    %c0_2 = arith.constant 0 : index
    %1 = vector.load %arg1[%c0_1, %c0_2] : memref<1x4xf32, #tpu.memory_space<vmem>>, vector<1x4xf32>
    %2 = arith.mulf %0, %1 : vector<1x4xf32>
    %3 = vector.shape_cast %2 : vector<1x4xf32> to vector<1x1x4xf32>
    %cst = arith.constant dense<0.000000e+00> : vector<1xf32>
    %4 = vector.multi_reduction <add>, %3, %cst [1, 2] : vector<1x1x4xf32> to vector<1xf32>
    %5 = vector.shape_cast %4 : vector<1xf32> to vector<1x1x1xf32>
    %6 = vector.extract %5[0, 0, 0] : f32 from vector<1x1x1xf32>
    %cst_3 = arith.constant 2.500000e-01 : f32
    %7 = arith.mulf %6, %cst_3 : f32
    %8 = vector.broadcast %7 : f32 to vector<1x1xf32>
    %c0_4 = arith.constant 0 : index
    %c0_5 = arith.constant 0 : index
    %9 = vector.load %arg2[%c0_4, %c0_5] : memref<1x1xf32, #tpu.memory_space<vmem>>, vector<1x1xf32>
    tpu.vector_store %arg2[%c0_4, %c0_5], %8 {strides = array<i32>} : memref<1x1xf32, #tpu.memory_space<vmem>>, vector<1x1xf32>,
    return
  }
}

</mosaic_0001>

<bundles_post_ra>
// kernel: tpu_custom_call.1
= control target key start
LH: loop header
LB: loop body
LE: loop exit
PB: predicated region body
PF: predicated region fallthrough
CT: control target
= control target key end

     0   :  { %7 = vsyncpa [#allocation3], 0  ;;  %s186_s0 = inlined_call_operand.hbm [shape: f32[1,4], index: 0, kind: input, shape index: {}]   ;;  %s187_s1 = inlined_call_operand.hbm [shape: f32[1,4], index: 1, kind: input, shape index: {}]   ;;  %s188_s2 = inlined_call_operand.hbm [shape: f32[1,1], index: 2, kind: output, shape index: {}]  }
   0x1   :  { %8 = vsyncpa [#allocation6], 0 }
   0x2   :  { %9 = vsyncpa [#allocation4], 0  ;;  %s15_s11 = sshll.u32 %s186_s0, 4  ;;  %s159_s12 = smov [#allocation2]   ;;  %s16_s11 = int_to_ptr.hbm [resolvable:$true] %s15_s11 }
   0x3   :  { %s17_s13 = sshll.u32 %s159_s12, 4  ;;  %s26_s16 = sshll.u32 %s187_s1, 4  ;;  %s18_s13 = int_to_ptr.vmem [resolvable:$true] %s17_s13  ;;  %s27_s16 = int_to_ptr.hbm [resolvable:$true] %s26_s16 }
   0x4   :  { %20 = dma.hbm_to_vmem [thread:$0]  %s16_s11, 16, %s18_s13, [#allocation3]  }
   0x5   :  { %s160_s17 = smov [#allocation5]  }
   0x6   :  { %s28_s18 = sshll.u32 %s160_s17, 4  ;;  %s29_s18 = int_to_ptr.vmem [resolvable:$true] %s28_s18 }
   0x7   :  { %31 = dma.hbm_to_vmem [thread:$0]  %s27_s16, 16, %s29_s18, [#allocation6]  }
   0x8   :  { %153 = dma.done.wait [#allocation3], 16  }
   0x9   :  { %154 = vsyncadd [#allocation3], 4294967280 }
   0xa   :  { %155 = dma.done.wait [#allocation6], 16  }
   0xb   :  { %156 = vsyncadd [#allocation6], 4294967280  ;;  %v40_v0 = vld [vmem:[#allocation2] sm:$0x1]  ;;  %v41_v1 = vld [vmem:[#allocation5] sm:$0x1] }
   0xc   :  { %vm43_vm0 = vcmask 24576   ;;  %v42_v2 = vmul.f32 %v41_v1, %v40_v0  ;;  %s161_s0 = smov [#allocation7]   ;;  %s65_s21 = sshll.u32 %s188_s2, 4  ;;  %vm56_vm1 = vcmask 0   ;;  %s66_s21 = int_to_ptr.hbm [resolvable:$true] %s65_s21 }
   0xd   :  { %s63_s1 = sshll.u32 %s161_s0, 4  ;;  %s64_s1 = int_to_ptr.vmem [resolvable:$true] %s63_s1 }
   0xe   :  { %v44_v3 = vsel %vm43_vm0, %v42_v2, 0.0 }
   0xf   :  { %45 = vadd.xlane.f32.xlu0 %v44_v3 }
  0x82   :  { %v46_v4 = vpop.xlane.xlu0 %45 }
  0x83   :  { %v47_v5 = vrot.slane %v46_v4, 4 }
  0x85   :  { %v48_v6 = vadd.f32 %v47_v5, %v46_v4 }
  0x87   :  { %v49_v7 = vrot.slane %v48_v6, 2 }
  0x89   :  { %v50_v8 = vadd.f32 %v49_v7, %v48_v6 }
  0x8b   :  { %v51_v9 = vrot.slane %v50_v8, 1 }
  0x8d   :  { %v52_v10 = vadd.f32 %v51_v9, %v50_v8 }
  0x8f   :  { %76 = vpush %v52_v10 }
  0xc0   :  { %s77_s22 = spop %76 }
  0xc1   :  { %s54_s23 = smul.f32 0.25, %s77_s22 }
  0xc3   :  { %v55_v11 = vstv %s54_s23 }
  0xc4   :  { %57 = vst.msk [vmem:[#allocation7] sm:$0x1] %vm56_vm1, %v55_v11 }
  0xc5   :  { %68 = dma.vmem_to_hbm [thread:$0]  %s64_s1, 16, %s66_s21, [#allocation4]  }
  0xc6   :  { %157 = dma.done.wait [#allocation4], 16  }
  0xc7   :  { %158 = vsyncadd [#allocation4], 4294967280 }
  0xc8   :  { %73 = vsyncpa [#allocation3], 1 }
  0xc9   :  { %74 = vsyncpa [#allocation6], 1 }
  0xca   :  { %75 = vsyncpa [#allocation4], 1 }

</bundles_post_ra>
